<compile_context>
chip_gen: v5e
topology: v5e:2x2
jax: 0.10.0
libtpu: 0.0.40
codegen_flags: <defaults>
</compile_context>

<pallas_src>
import jax
import jax.numpy as jnp
from jax.experimental import pallas as pl
from jax.experimental.pallas import tpu as pltpu


HIDDEN = 768          # hardcoded in the PyTorch module (Linear(2, 768), Linear(768, ...))
PRED_NUM = 8          # predicate2id_num
VOCAB = 64
LANE = 128


# ----------------------------- Pallas kernel --------------------------------

def object_head_kernel(sp_ref, wsp_ref, bsp_ref,
                       enc_ref, wobj_ref, bobj_ref,
                       o_ref):
    """One (batch b, seq-tile s) grid step.

    sp_ref  : (B, 2)       subject positions, f32 (tiny, VMEM-resident)
    wsp_ref : (2, H)       dense_subject_position weight (in, out), f32
    bsp_ref : (1, H)       dense_subject_position bias, f32
    enc_ref : (1, TS, H)   encoder sequence tile, bf16
    wobj_ref: (H, Np)      dense_object weight, N padded to 128 lanes, bf16
    bobj_ref: (1, Np)      dense_object bias (padded), f32
    o_ref   : (1, TS, Np)  sigmoid(dense_object(...))**4, bf16 (padded on N)
    """
    B = sp_ref.shape[0]
    b = pl.program_id(0)

    # dense_subject_position: K=2 is degenerate for the MXU -> two VPU
    # scalar-vector FMAs + bias.  (B,H) is tiny, so compute all batch rows and
    # mask-select row b (avoids a dynamic sublane slice).
    sp = sp_ref[...]                                          # (B, 2) f32
    sp_proj_all = (sp[:, 0:1] * wsp_ref[0:1, :]
                   + sp[:, 1:2] * wsp_ref[1:2, :]
                   + bsp_ref[...])                            # (B, H) f32
    row_ids = jax.lax.broadcasted_iota(jnp.int32, (B, 1), 0)
    sp_proj = jnp.sum(jnp.where(row_ids == b, sp_proj_all, 0.0),
                      axis=0, keepdims=True)                  # (1, H) f32

    # Broadcast add over the sequence tile in bf16 (v6e/v7x bf16 VALU; the
    # kernel is HBM-bound so the VPU add is non-binding on v5e as well).
    obj = enc_ref[0] + sp_proj.astype(jnp.bfloat16)           # (TS, H) bf16

    # dense_object: lane-dense MXU matmul, f32 accumulation.
    logits = jnp.dot(obj, wobj_ref[...],
                     preferred_element_type=jnp.float32)      # (TS, Np) f32
    logits = logits + bobj_ref[...]

    # sigmoid via exact EUP reciprocal (EUP slot is otherwise idle on this
    # mem-bound kernel); pow 4 as two multiplies.
    sig = pl.reciprocal(1.0 + jnp.exp(-logits))
    sig2 = sig * sig
    o_ref[0] = (sig2 * sig2).astype(o_ref.dtype)


def _pick_seq_tile(seq_len, max_tile=512):
    """Largest sequence tile <= max_tile that evenly divides seq_len.

    TS=512 keeps 2x(TS*H) bf16 input buffers + 2x(TS*128) bf16 output buffers
    under ~2 MiB -> safe on v5e (16 MiB scoped), v6e, and v7x (64 MiB phys).
    """
    if seq_len <= max_tile:
        return seq_len
    for ts in range(max_tile, 7, -1):
        if seq_len % ts == 0 and ts % 8 == 0:
            return ts
    return seq_len  # fall back to the whole sequence


def object_head(enc_out, subject_position, w_sp, b_sp, w_obj_pad, b_obj_pad,
                predicate2id_num):
    """enc_out: [B,S,H] bf16, subject_position: [B,2] f32 -> [B,S,P,2] f32."""
    B, S, H = enc_out.shape
    P2 = predicate2id_num * 2
    P2_pad = w_obj_pad.shape[-1]
    TS = _pick_seq_tile(S)

    out = pl.pallas_call(
        object_head_kernel,
        out_shape=jax.ShapeDtypeStruct((B, S, P2_pad), jnp.bfloat16),
        grid_spec=pltpu.PrefetchScalarGridSpec(
            num_scalar_prefetch=0,
            grid=(B, S // TS),
            in_specs=[
                pl.BlockSpec((B, 2),      lambda b, s: (0, 0)),     # subject_position
                pl.BlockSpec((2, H),      lambda b, s: (0, 0)),     # W_sp
                pl.BlockSpec((1, H),      lambda b, s: (0, 0)),     # b_sp
                pl.BlockSpec((1, TS, H),  lambda b, s: (b, s, 0)),  # encoder tile (bf16)
                pl.BlockSpec((H, P2_pad), lambda b, s: (0, 0)),     # W_obj (padded bf16)
                pl.BlockSpec((1, P2_pad), lambda b, s: (0, 0)),     # b_obj (padded f32)
            ],
            out_specs=pl.BlockSpec((1, TS, P2_pad), lambda b, s: (b, s, 0)),
        ),
        compiler_params=pltpu.CompilerParams(
            dimension_semantics=("parallel", "parallel"),  # megacore sharding on v7x
            vmem_limit_bytes=32 * 1024 * 1024,             # safe on v5e/v6e/v7x
        ),
    )(subject_position, w_sp, b_sp, enc_out, w_obj_pad, b_obj_pad)

    # Slice away lane padding, reshape glue [B,S,2P] -> [B,S,P,2], upcast.
    return out[..., :P2].astype(jnp.float32).reshape(B, S, predicate2id_num, 2)


# ------------------------- deterministic parameters --------------------------

def init_params(key):
    ks = jax.random.split(key, 8)
    P2 = PRED_NUM * 2
    P2_pad = max(LANE, ((P2 + LANE - 1) // LANE) * LANE)

    w_obj = jax.random.normal(ks[5], (HIDDEN, P2), jnp.float32) * 0.02
    b_obj = jax.random.normal(ks[6], (1, P2), jnp.float32) * 0.02
    # Kernel-layout copies of dense_object (lane-dense 128-wide N, weight
    # pre-cast to bf16).  Built ONCE here instead of per forward call.
    w_obj_pad = jnp.zeros((HIDDEN, P2_pad), jnp.bfloat16).at[:, :P2].set(
        w_obj.astype(jnp.bfloat16))
    b_obj_pad = jnp.zeros((1, P2_pad), jnp.float32).at[:, :P2].set(b_obj)

    return {
        # stand-in encoder (subject_model) params
        "emb":    jax.random.normal(ks[0], (VOCAB, HIDDEN), jnp.float32) * 0.02,
        "w_enc":  jax.random.normal(ks[1], (HIDDEN, HIDDEN), jnp.float32) * 0.02,
        "b_enc":  jnp.zeros((HIDDEN,), jnp.float32),
        "w_subj": jax.random.normal(ks[2], (HIDDEN, 2), jnp.float32) * 0.02,
        "b_subj": jnp.zeros((2,), jnp.float32),
        # ObjectModel params
        "w_sp":   jax.random.normal(ks[3], (2, HIDDEN), jnp.float32) * 0.05,
        "b_sp":   jax.random.normal(ks[4], (1, HIDDEN), jnp.float32) * 0.05,
        "w_obj":  w_obj,
        "b_obj":  b_obj,
        # kernel-layout (padded / pre-cast) copies
        "w_obj_pad": w_obj_pad,
        "b_obj_pad": b_obj_pad,
    }


def encoder_stub(params, input_ids, attention_mask=None):
    """Deterministic stand-in for the injected `subject_model` submodule.

    Returns (output [B,S,H] bf16, subject_out [B,S,2] f32) like the
    BERT-based subject model used in the original pipeline.
    """
    # TODO(synk): the real `subject_model` is an external pretrained encoder;
    # it is replaced by this deterministic embedding + linear stub.
    x = params["emb"][input_ids]                                   # [B,S,H]
    output = jnp.tanh(x @ params["w_enc"] + params["b_enc"])       # [B,S,H]
    if attention_mask is not None:
        output = output * attention_mask[..., None].astype(output.dtype)
    subject_out = jax.nn.sigmoid(output @ params["w_subj"] + params["b_subj"])
    # Emit the sequence activation in bf16 so the object head's dominant HBM
    # read is half-width (the cast fuses into the encoder epilogue in XLA).
    return output.astype(jnp.bfloat16), subject_out


def object_model_forward(params, input_ids, subject_position, attention_mask=None):
    output, subject_out = encoder_stub(params, input_ids, attention_mask)
    object_out = object_head(output, subject_position,
                             params["w_sp"], params["b_sp"],
                             params["w_obj_pad"], params["b_obj_pad"],
                             PRED_NUM)
    return subject_out, object_out


# ----------------------------------- main ------------------------------------

if __name__ == "__main__":
    B, S = 2, 8
    key = jax.random.PRNGKey(0)
    k_param, k_ids, k_pos = jax.random.split(key, 3)

    params = init_params(k_param)
    input_ids = jax.random.randint(k_ids, (B, S), 0, VOCAB, dtype=jnp.int32)
    # subject start/end positions as floats (matches Linear(2, 768) input)
    subject_position = jax.random.randint(k_pos, (B, 2), 0, S).astype(jnp.float32)
    attention_mask = jnp.ones((B, S), jnp.float32)

    subject_out, object_out = object_model_forward(
        params, input_ids, subject_position, attention_mask)
    jax.block_until_ready((subject_out, object_out))

    assert subject_out.shape == (B, S, 2)
    assert object_out.shape == (B, S, PRED_NUM, 2)
    assert object_out.dtype == jnp.float32
    assert bool(jnp.all(jnp.isfinite(object_out)))
    assert bool(jnp.all((object_out >= 0.0) & (object_out <= 1.0)))

    print("KERNEL_OK")
</pallas_src>

<mosaic_0001>
module attributes {stable_mosaic.version = 11 : i64} {
  func.func @object_head_kernel(%arg0: i32, %arg1: i32, %arg2: memref<2x2xf32, #tpu.memory_space<vmem>>, %arg3: memref<2x768xf32, #tpu.memory_space<vmem>>, %arg4: memref<1x768xf32, #tpu.memory_space<vmem>>, %arg5: memref<1x8x768xbf16, #tpu.memory_space<vmem>>, %arg6: memref<768x128xbf16, #tpu.memory_space<vmem>>, %arg7: memref<1x128xf32, #tpu.memory_space<vmem>>, %arg8: memref<1x8x128xbf16, #tpu.memory_space<vmem>>) attributes {dimension_semantics = [#tpu.dimension_semantics<parallel>, #tpu.dimension_semantics<parallel>], iteration_bounds = array<i64: 2, 1>, scalar_prefetch = 0 : i64, scratch_operands = 0 : i64, tpu.core_type = #tpu.core_type<tc>, window_params = [{pipeline_mode = #tpu.pipeline_mode<synchronous>, transform_indices = @transform_0, window_bounds = array<i64: 2, 2>}, {pipeline_mode = #tpu.pipeline_mode<synchronous>, transform_indices = @transform_1, window_bounds = array<i64: 2, 768>}, {pipeline_mode = #tpu.pipeline_mode<synchronous>, transform_indices = @transform_2, window_bounds = array<i64: 1, 768>}, {transform_indices = @transform_3, window_bounds = array<i64: 1, 8, 768>}, {pipeline_mode = #tpu.pipeline_mode<synchronous>, transform_indices = @transform_4, window_bounds = array<i64: 768, 128>}, {pipeline_mode = #tpu.pipeline_mode<synchronous>, transform_indices = @transform_5, window_bounds = array<i64: 1, 128>}, {transform_indices = @transform_6, window_bounds = array<i64: 1, 8, 128>}]} {
    %c0 = arith.constant 0 : index
    %c0_0 = arith.constant 0 : index
    %0 = vector.load %arg2[%c0, %c0_0] : memref<2x2xf32, #tpu.memory_space<vmem>>, vector<2x2xf32>
    %1 = vector.extract_strided_slice %0 {offsets = [0, 0], sizes = [2, 1], strides = [1, 1]} : vector<2x2xf32> to vector<2x1xf32>
    %c0_1 = arith.constant 0 : index
    %c0_2 = arith.constant 0 : index
    %2 = vector.load %arg3[%c0_1, %c0_2] : memref<2x768xf32, #tpu.memory_space<vmem>>, vector<1x768xf32>
    %3 = vector.broadcast %1 : vector<2x1xf32> to vector<2x768xf32>
    %4 = vector.broadcast %2 : vector<1x768xf32> to vector<2x768xf32>
    %5 = arith.mulf %3, %4 : vector<2x768xf32>
    %6 = vector.extract_strided_slice %0 {offsets = [0, 1], sizes = [2, 1], strides = [1, 1]} : vector<2x2xf32> to vector<2x1xf32>
    %c1 = arith.constant 1 : index
    %c0_3 = arith.constant 0 : index
    %7 = vector.load %arg3[%c1, %c0_3] : memref<2x768xf32, #tpu.memory_space<vmem>>, vector<1x768xf32>
    %8 = vector.broadcast %6 : vector<2x1xf32> to vector<2x768xf32>
    %9 = vector.broadcast %7 : vector<1x768xf32> to vector<2x768xf32>
    %10 = arith.mulf %8, %9 : vector<2x768xf32>
    %11 = arith.addf %5, %10 : vector<2x768xf32>
    %c0_4 = arith.constant 0 : index
    %c0_5 = arith.constant 0 : index
    %12 = vector.load %arg4[%c0_4, %c0_5] : memref<1x768xf32, #tpu.memory_space<vmem>>, vector<1x768xf32>
    %13 = vector.broadcast %12 : vector<1x768xf32> to vector<2x768xf32>
    %14 = arith.addf %11, %13 : vector<2x768xf32>
    %15 = tpu.iota {dimensions = array<i32: 0>} : vector<2x1xi32>
    %16 = vector.broadcast %arg0 : i32 to vector<2x1xi32>
    %17 = arith.cmpi eq, %15, %16 : vector<2x1xi32>
    %cst = arith.constant 0.000000e+00 : f32
    %18 = vector.shape_cast %17 : vector<2x1xi1> to vector<2x1xi1>
    %19 = vector.broadcast %18 : vector<2x1xi1> to vector<2x768xi1>
    %20 = vector.broadcast %cst : f32 to vector<2x768xf32>
    %21 = arith.select %19, %14, %20 : vector<2x768xi1>, vector<2x768xf32>
    %cst_6 = arith.constant dense<0.000000e+00> : vector<768xf32>
    %22 = vector.multi_reduction <add>, %21, %cst_6 [0] : vector<2x768xf32> to vector<768xf32>
    %23 = vector.shape_cast %22 : vector<768xf32> to vector<1x768xf32>
    %c0_7 = arith.constant 0 : index
    %c0_8 = arith.constant 0 : index
    %c0_9 = arith.constant 0 : index
    %24 = vector.load %arg5[%c0_7, %c0_8, %c0_9] : memref<1x8x768xbf16, #tpu.memory_space<vmem>>, vector<1x8x768xbf16>
    %25 = vector.shape_cast %24 : vector<1x8x768xbf16> to vector<8x768xbf16>
    %26 = arith.truncf %23 : vector<1x768xf32> to vector<1x768xbf16>
    %27 = vector.broadcast %26 : vector<1x768xbf16> to vector<8x768xbf16>
    %28 = arith.addf %25, %27 : vector<8x768xbf16>
    %c0_10 = arith.constant 0 : index
    %c0_11 = arith.constant 0 : index
    %29 = vector.load %arg6[%c0_10, %c0_11] : memref<768x128xbf16, #tpu.memory_space<vmem>>, vector<768x128xbf16>
    %cst_12 = arith.constant dense<0.000000e+00> : vector<8x128xf32>
    %30 = tpu.matmul %28, %29, %cst_12 {dimension_numbers = #tpu.dot_dimension_numbers<[1], [0], [0], [1], [0, 0, 1, 1], [], []>} : vector<8x768xbf16>, vector<768x128xbf16>, vector<8x128xf32> -> vector<8x128xf32>
    %c0_13 = arith.constant 0 : index
    %c0_14 = arith.constant 0 : index
    %31 = vector.load %arg7[%c0_13, %c0_14] : memref<1x128xf32, #tpu.memory_space<vmem>>, vector<1x128xf32>
    %32 = vector.broadcast %31 : vector<1x128xf32> to vector<8x128xf32>
    %33 = arith.addf %30, %32 : vector<8x128xf32>
    %cst_15 = arith.constant 0.000000e+00 : f32
    %34 = vector.broadcast %cst_15 : f32 to vector<8x128xf32>
    %35 = arith.subf %34, %33 : vector<8x128xf32>
    %36 = math.exp %35 : vector<8x128xf32>
    %cst_16 = arith.constant 1.000000e+00 : f32
    %37 = vector.broadcast %cst_16 : f32 to vector<8x128xf32>
    %38 = arith.addf %37, %36 : vector<8x128xf32>
    %39 = tpu.reciprocal %38 : vector<8x128xf32> -> vector<8x128xf32>
    %40 = arith.mulf %39, %39 : vector<8x128xf32>
    %41 = arith.mulf %40, %40 : vector<8x128xf32>
    %42 = arith.truncf %41 : vector<8x128xf32> to vector<8x128xbf16>
    %c0_17 = arith.constant 0 : index
    %c0_18 = arith.constant 0 : index
    %c0_19 = arith.constant 0 : index
    %43 = vector.load %arg8[%c0_17, %c0_18, %c0_19] : memref<1x8x128xbf16, #tpu.memory_space<vmem>>, vector<1x8x128xbf16>
    %44 = vector.shape_cast %43 : vector<1x8x128xbf16> to vector<8x128xbf16>
    %45 = vector.shape_cast %42 : vector<8x128xbf16> to vector<1x8x128xbf16>
    tpu.vector_store %arg8[%c0_17, %c0_18, %c0_19], %45 {strides = array<i32>} : memref<1x8x128xbf16, #tpu.memory_space<vmem>>, vector<1x8x128xbf16>,
    return
  }
  func.func @transform_0(%arg0: i32, %arg1: i32) -> (i32, i32) {
    %c0_i32 = arith.constant 0 : i32
    %c0_i32_0 = arith.constant 0 : i32
    %c0_i32_1 = arith.constant 0 : i32
    return %c0_i32, %c0_i32_0 : i32, i32
  }
  func.func @transform_1(%arg0: i32, %arg1: i32) -> (i32, i32) {
    %c0_i32 = arith.constant 0 : i32
    %c0_i32_0 = arith.constant 0 : i32
    %c0_i32_1 = arith.constant 0 : i32
    return %c0_i32, %c0_i32_0 : i32, i32
  }
  func.func @transform_2(%arg0: i32, %arg1: i32) -> (i32, i32) {
    %c0_i32 = arith.constant 0 : i32
    %c0_i32_0 = arith.constant 0 : i32
    %c0_i32_1 = arith.constant 0 : i32
    return %c0_i32, %c0_i32_0 : i32, i32
  }
  func.func @transform_3(%arg0: i32, %arg1: i32) -> (i32, i32, i32) {
    %c0_i32 = arith.constant 0 : i32
    %c0_i32_0 = arith.constant 0 : i32
    return %arg0, %arg1, %c0_i32 : i32, i32, i32
  }
  func.func @transform_4(%arg0: i32, %arg1: i32) -> (i32, i32) {
    %c0_i32 = arith.constant 0 : i32
    %c0_i32_0 = arith.constant 0 : i32
    %c0_i32_1 = arith.constant 0 : i32
    return %c0_i32, %c0_i32_0 : i32, i32
  }
  func.func @transform_5(%arg0: i32, %arg1: i32) -> (i32, i32) {
    %c0_i32 = arith.constant 0 : i32
    %c0_i32_0 = arith.constant 0 : i32
    %c0_i32_1 = arith.constant 0 : i32
    return %c0_i32, %c0_i32_0 : i32, i32
  }
  func.func @transform_6(%arg0: i32, %arg1: i32) -> (i32, i32, i32) {
    %c0_i32 = arith.constant 0 : i32
    %c0_i32_0 = arith.constant 0 : i32
    return %arg0, %arg1, %c0_i32 : i32, i32, i32
  }
}

</mosaic_0001>

<bundles_post_ra>
// kernel: tpu_custom_call.1
= control target key start
LH: loop header
LB: loop body
LE: loop exit
PB: predicated region body
PF: predicated region fallthrough
CT: control target
= control target key end

     0   :  { %s2005_s0 = inlined_call_operand.hbm [shape: f32[2,2], index: 0, kind: input, shape index: {}]   ;;  %s2006_s1 = inlined_call_operand.hbm [shape: f32[2,768], index: 1, kind: input, shape index: {}]   ;;  %s2007_s2 = inlined_call_operand.hbm [shape: f32[1,768], index: 2, kind: input, shape index: {}]   ;;  %s2008_s3 = inlined_call_operand.hbm [shape: bf16[2,8,768], index: 3, kind: input, shape index: {}]   ;;  %s2009_s4 = inlined_call_operand.hbm [shape: bf16[768,128], index: 4, kind: input, shape index: {}]   ;;  %s2010_s5 = inlined_call_operand.vmem [shape: f32[1,128], index: 5, kind: input, shape index: {}]   ;;  %s2011_s6 = inlined_call_operand.hbm [shape: bf16[2,8,128], index: 6, kind: output, shape index: {}]  }
   0x1   :  { %2012 = sst [smem:[#allocation17_spill]] %s2005_s0 }
   0x2   :  { %2013 = sst [smem:[#allocation18_spill]] %s2006_s1 }
   0x3   :  { %11 = vsyncpa [#allocation3], 0 }
   0x4   :  { %12 = vsyncpa [#allocation6], 0 }
   0x5   :  { %13 = vsyncpa [#allocation9], 0 }
   0x6   :  { %15 = vsyncpa [#allocation9 + $0x1], 0 }
   0x7   :  { %16 = vsyncpa [#allocation4], 0 }
   0x8   :  { %18 = vsyncpa [#allocation4 + $0x1], 0  ;;  %s1802_s21 = smov 0   ;;  %s1804_s22 = smov 0  }
   0x9   :  { %s1806_s23 = smov 0   ;;  %s1808_s24 = smov 0  }
   0xa   :  { %s1810_s25 = smov 0   ;;  %s1812_s26 = smov 0  }
   0xb LB: > { %s1833_s27 = sadd.s32 4294967295, %s1757_s26   ;;  %s1138_s28 = sadd.s32 4294967294, %s1757_s26   ;;  %s1757_s26 = sphi %s1812_s26, %s24_s26   ;;  %s1753_s25 = sphi %s1810_s25, %s2027_s25   ;;  %s1749_s24 = sphi %s1808_s24, %s2026_s24   ;;  %s1745_s23 = sphi %s1806_s23, %s2025_s23   ;;  %s1741_s22 = sphi %s1804_s22, %s2024_s22   ;;  %s1737_s21 = sphi %s1802_s21, %s2023_s21  }
   0xc   : > { %p121_p0 = scmp.ne.s32.totalorder %s1741_s22, %s1737_s21  ;;  %p122_p1 = scmp.eq.s32.totalorder %s1833_s27, 0 }
   0xd   : > { %p189_p2 = scmp.eq.s32.totalorder %s1833_s27, 1  ;;  %p195_p3 = scmp.eq.s32.totalorder %s1138_s28, 1 }
   0xe   : > { %p1842_p4 = por %p122_p1, %p121_p0  ;;  %p1139_p5 = scmp.ge.s32.totalorder %s1757_s26, 1 }
   0xf   : > { %p1847_p6 = por %p195_p3, %p121_p0  ;;  %p202_p7 = scmp.lt.s32.totalorder %s1757_s26, 3 }
  0x10   : > { %s2016_s1 = sld [smem:[#allocation18_spill]]  ;;  %p1144_p9 = scmp.ge.s32.totalorder %s1757_s26, 2 }
  0x11   : > { %p1855_p8 = pnand %p1139_p5, %p202_p7  ;;  %s1759_s11 = smov [#allocation5]  }
  0x12   : > { %s228_s12 = sshll.u32 %s1759_s11, 4  ;;  %s249_s15 = sshll.u32 %s2009_s4, 4  ;;  %s229_s12 = int_to_ptr.vmem [resolvable:$true] %s228_s12  ;;  %s250_s15 = int_to_ptr.hbm [resolvable:$true] %s249_s15 }
  0x13   : > { %p1419_p10 = pneg %p1855_p8  ;;  %s1760_s17 = smov [#allocation10]  }
  0x14   : > { %s251_s18 = sshll.u32 %s1760_s17, 4  ;;  %s1761_s19 = smov 64   ;;  %s252_s18 = int_to_ptr.vmem [resolvable:$true] %s251_s18 }
  0x15   : > { %p1867_p11 = pnand %p1419_p10, %p122_p1  ;;  %s1762_s20 = smov 4  }
  0x16   : > { %s226_s9 = sshll.u32 %s2016_s1, 4  ;;  %s2019_s0 = sld [smem:[#allocation17_spill]]  ;;  %s227_s9 = int_to_ptr.hbm [resolvable:$true] %s226_s9 }
  0x17   : > { %1425 = dma.hbm_to_vmem [thread:$0]  (!%p1867_p11), %s227_s9, 192, %s229_s12, [#allocation6]  }
  0x18   : > { %1431 = dma.hbm_to_vmem [thread:$0]  (!%p1867_p11), %s250_s15, 6144, %s252_s18, [#allocation9], %s1761_s19, %s1761_s19, %s1762_s20  }
  0x19   : > { %s238_s9 = sshll.u32 %s2007_s2, 4  ;;  %s1763_s12 = smov [#allocation2]   ;;  %s239_s9 = int_to_ptr.hbm [resolvable:$true] %s238_s9 }
  0x1a   : > { %s216_s14 = sshll.u32 %s1763_s12, 4  ;;  %s1764_s15 = smov [#allocation7]   ;;  %s217_s14 = int_to_ptr.vmem [resolvable:$true] %s216_s14 }
  0x1b   : > { %s240_s17 = sshll.u32 %s1764_s15, 4  ;;  %s36_s18 = sadd.s32 1, %s1753_s25  ;;  %s241_s17 = int_to_ptr.vmem [resolvable:$true] %s240_s17 }
  0x1c   : > { %s214_s8 = sshll.u32 %s2019_s0, 4  ;;  %s108_s19 = sadd.s32 1, %s1745_s23  ;;  %s215_s8 = int_to_ptr.hbm [resolvable:$true] %s214_s8 }
  0x1d   : > { %1422 = dma.hbm_to_vmem [thread:$0]  (!%p1867_p11), %s215_s8, 32, %s217_s14, [#allocation3]  }
  0x1e   : > { %1428 = dma.hbm_to_vmem [thread:$0]  (!%p1867_p11), %s239_s9, 96, %s241_s17, [#allocation6]  }
  0x1f   : > { %p38_p12 = scmp.ge.s32.totalorder %s36_s18, 2  ;;  %p115_p13 = scmp.ne.s32.totalorder %s1745_s23, %s1741_s22 }
  0x20   : > { %p116_p0 = scmp.eq.s32.totalorder %s1757_s26, 0  ;;  %p1444_p3 = scmp.lt.s32.totalorder %s1757_s26, 2 }
  0x21   : > { %s2029_s18 = smov (%p38_p12, %s36_s18), 0  ;;  %p1895_p7 = por %p189_p2, %p115_p13 }
  0x22   : > { %p117_p5 = por %p116_p0, %p115_p13  ;;  %s103_s28 = ssub.s32 %s1753_s25, %s2029_s18 }
  0x23   : > { %s268_s16 = sand.u32 1, %s1757_s26   ;;  %p106_p10 = scmp.eq.s32.totalorder %s103_s28, 0 }
  0x24   : > { %s270_s7 = sand.u32 1, %s1745_s23   ;;  %s1397_s8 = smul.u32 24, %s1753_s25 }
  0x25   : > { %s1905_s11 = scalar_select %p106_p10, %s1745_s23, %s108_s19  }
  0x26   : > { %s1396_s13 = smul.u32 24, %s270_s7  ;;  %s279_s14 = scalar_lea.hbm %s2008_s3, %s1397_s8 }
  0x27   : > { %s281_s15 = sshll.u32 %s279_s14, 4  ;;  %p1433_p11 = pnand %p1444_p3, %p117_p5  ;;  %s282_s15 = int_to_ptr.hbm [resolvable:$true] %s281_s15 }
  0x28   : > { %s272_s17 = scalar_lea.vmem [#allocation8], %s1396_s13  ;;  %s269_s1 = scalar_lea.sflag [#allocation9], %s268_s16 }
  0x29   : > { %s283_s0 = sshll.u32 %s272_s17, 4  ;;  %292 = sbr.rel (%p1855_p8) target bundleno = 395 (0x18b), region = 44  ;;  %s284_s0 = int_to_ptr.vmem [resolvable:$true] %s283_s0 }
  0x2a   : > { %1435 = dma.hbm_to_vmem [thread:$0]  (!%p1433_p11), %s282_s15, 384, %s284_s0, %s269_s1  }
  0x2e   : > { %1716 = dma.done.wait (%p122_p1), [#allocation3], 32  }
  0x2f   : > { %1718 = vsyncadd (%p122_p1), [#allocation3], 4294967264 }
  0x30   : > { %1720 = dma.done.wait (%p122_p1), [#allocation6], 288  }
  0x31   : > { %1722 = vsyncadd (%p122_p1), [#allocation6], 4294967008  ;;  %s309_s19 = sand.u32 1, %s1833_s27   ;;  %s1924_s0 = sand.u32 1, %s1741_s22  }
  0x32   : > { %s1398_s1 = smul.u32 24, %s1924_s0  ;;  %s310_s10 = scalar_lea.sflag [#allocation9], %s309_s19 }
  0x34   : > { %s1927_s28 = scalar_lea.vmem [#allocation8], %s1398_s1 }
  0x35   : > { %1724 = dma.done.wait (%p1842_p4), %s310_s10, 384  }
  0x36   : > { %1726 = vsyncadd (%p1842_p4), %s310_s10, 4294966912 }
  0x37   : > { %1728 = dma.done.wait (%p122_p1), [#allocation9], 6144  }
  0x38   : > { %1730 = vsyncadd (%p122_p1), [#allocation9], 4294961152  ;;  %v1765_v0 = vmov 0   ;;  %v348_v1 = vld [vmem:[#allocation2] sm:$0x3]  ;;  %v1354_v4 = vld [vmem:[#allocation10 + $0x30] sm:$0xff]  ;;  %v425_v51 = vlaneseq  ;;  %v427_v55 = vstv %s1749_s24 }
  0x39   : > { %1506 = vset.pattern.permute.xlu0 %v1765_v0  ;;  %v1355_v2 = vld [vmem:[#allocation10 + $0x38] sm:$0xff]  ;;  %v1362_v5 = vld [vmem:[#allocation10 + $0x70] sm:$0xff]  ;;  %v1766_v6 = vmov 1   ;;  %v1353_v7 = vld [vmem:[#allocation10 + $0x28] sm:$0xff]  ;;  %vm437_vm1 = vcmask 1041408   ;;  %s1151_s16 = sshll.u32 %s1924_s0, 2 }
  0x3a   : > { %v1363_v3 = vld [vmem:[#allocation10 + $0x78] sm:$0xff]  ;;  %352 = vperm.xlu0 %1506, %v348_v1   ;;  %898 = vmatpush.bf16.msra.mxu0 %v1355_v2  ;;  %v1361_v8 = vld [vmem:[#allocation10 + $0x68] sm:$0xff]  ;;  %v1352_v10 = vld [vmem:[#allocation10 + $0x20] sm:$0xff]  ;;  %s1345_s7 = sshll.u32 %s1749_s24, 2  ;;  %s347_s12 = scalar_lea.vmem [#allocation11], %s1151_s16 }
  0x3b   : > { %911 = vmatpush.bf16.msra.mxu1 %v1363_v3  ;;  %v1371_v9 = vld [vmem:[#allocation10 + $0xb8] sm:$0xff]  ;;  %v1360_v11 = vld [vmem:[#allocation10 + $0x60] sm:$0xff]  ;;  %v1370_v15 = vld [vmem:[#allocation10 + $0xb0] sm:$0xff]  ;;  %s1010_s9 = scalar_lea.hbm %s2011_s6, %s1345_s7  ;;  %s1012_s14 = sshll.u32 %s347_s12, 4  ;;  %s1013_s14 = int_to_ptr.vmem [resolvable:$true] %s1012_s14 }
  0x3c   : > { %v1379_v12 = vld [vmem:[#allocation10 + $0xf8] sm:$0xff]  ;;  %924 = vmatpush.bf16.msra.mxu2 %v1371_v9  ;;  %v1378_v16 = vld [vmem:[#allocation10 + $0xf0] sm:$0xff]  ;;  %v1369_v19 = vld [vmem:[#allocation10 + $0xa8] sm:$0xff]  ;;  %s1014_s15 = sshll.u32 %s1010_s9, 4  ;;  %s999_s24 = scalar_lea.sflag [#allocation4], %s1924_s0  ;;  %s1015_s15 = int_to_ptr.hbm [resolvable:$true] %s1014_s15 }
  0x3d   : > { %937 = vmatpush.bf16.msra.mxu3 %v1379_v12  ;;  %v1351_v13 = vld [vmem:[#allocation10 + $0x18] sm:$0xff]  ;;  %v1350_v17 = vld [vmem:[#allocation10 + $0x10] sm:$0xff]  ;;  %v1377_v20 = vld [vmem:[#allocation10 + $0xe8] sm:$0xff]  ;;  %s1677_s17 = sshra.s32 %s1015_s15, 4  ;;  %s1678_s17 = int_to_ptr.hbm [resolvable:$true] %s1677_s17 }
  0x3e   : > { %899 = vmatpush.bf16.msra.mxu0 %v1354_v4  ;;  %v1359_v14 = vld [vmem:[#allocation10 + $0x58] sm:$0xff]  ;;  %v1358_v18 = vld [vmem:[#allocation10 + $0x50] sm:$0xff]  ;;  %v1349_v21 = vld [vmem:[#allocation10 + $0x8] sm:$0xff]  ;;  %s1679_s19 = scalar_lea.hbm %s1678_s17, 4  ;;  %p1684_p8 = scmp.lt.s32.totalorder %s1678_s17, %s2011_s6 }
  0x3f   : > { %912 = vmatpush.bf16.msra.mxu1 %v1362_v5  ;;  %v1357_v22 = vld [vmem:[#allocation10 + $0x48] sm:$0xff]  ;;  %v1368_v23 = vld [vmem:[#allocation10 + $0xa0] sm:$0xff]  ;;  %v1367_v27 = vld [vmem:[#allocation10 + $0x98] sm:$0xff]  ;;  %v426_v5 = vshrl.u32 %v425_v51, 7  ;;  %p1680_p1 = scmp.ne.s32.totalorder %s1678_s17, %s1679_s19 }
  0x40   : > { %925 = vmatpush.bf16.msra.mxu2 %v1370_v15  ;;  %v1376_v24 = vld [vmem:[#allocation10 + $0xe0] sm:$0xff]  ;;  %v1375_v28 = vld [vmem:[#allocation10 + $0xd8] sm:$0xff]  ;;  %v1366_v31 = vld [vmem:[#allocation10 + $0x90] sm:$0xff] }
  0x41   : > { %938 = vmatpush.bf16.msra.mxu3 %v1378_v16  ;;  %v1348_v25 = vld [vmem:[#allocation10] sm:$0xff]  ;;  %v1387_v29 = vld [vmem:[#allocation10 + $0x138] sm:$0xff]  ;;  %v1374_v32 = vld [vmem:[#allocation10 + $0xd0] sm:$0xff]  ;;  %vm1938_vm0 = vcmp.eq.s32.totalorder %v426_v5, %v427_v55  ;;  %p1681_p2 = pnand %p1680_p1, %p1895_p7 }
  0x42   : > { %1507 = vset.pattern.permute.xlu0 %v1766_v6  ;;  %900 = vmatpush.bf16.msra.mxu0 %v1353_v7  ;;  %v1356_v26 = vld [vmem:[#allocation10 + $0x40] sm:$0xff]  ;;  %v1395_v30 = vld [vmem:[#allocation10 + $0x178] sm:$0xff]  ;;  %v1386_v33 = vld [vmem:[#allocation10 + $0x130] sm:$0xff] }
  0x43   : > { %377 = vperm.xlu0 %1507, %v348_v1   ;;  %913 = vmatpush.bf16.msra.mxu1 %v1361_v8  ;;  %v1394_v34 = vld [vmem:[#allocation10 + $0x170] sm:$0xff]  ;;  %v1365_v35 = vld [vmem:[#allocation10 + $0x88] sm:$0xff]  ;;  %v1364_v41 = vld [vmem:[#allocation10 + $0x80] sm:$0xff]  ;;  %p1682_p4 = pneg %p1681_p2 }
  0x44   : > { %926 = vmatpush.bf16.msra.mxu2 %v1369_v19  ;;  %v1373_v36 = vld [vmem:[#allocation10 + $0xc8] sm:$0xff]  ;;  %v1372_v42 = vld [vmem:[#allocation10 + $0xc0] sm:$0xff]  ;;  %v1383_v60 = vld [vmem:[#allocation10 + $0x118] sm:$0xff] }
  0x45   : > { %939 = vmatpush.bf16.msra.mxu3 %v1377_v20  ;;  %v1385_v37 = vld [vmem:[#allocation10 + $0x128] sm:$0xff]  ;;  %v1384_v43 = vld [vmem:[#allocation10 + $0x120] sm:$0xff]  ;;  %v1391_v61 = vld [vmem:[#allocation10 + $0x158] sm:$0xff] }
  0x46   : > { %901 = vmatpush.bf16.msra.mxu0 %v1352_v10  ;;  %v1393_v38 = vld [vmem:[#allocation10 + $0x168] sm:$0xff]  ;;  %v1392_v45 = vld [vmem:[#allocation10 + $0x160] sm:$0xff]  ;;  %v1390_v16 = vld [vmem:[#allocation10 + $0x150] sm:$0xff] }
  0x47   : > { %914 = vmatpush.bf16.msra.mxu1 %v1360_v11  ;;  %v349_v39 = vld [vmem:[#allocation5] ss:$2 sm:$0x3f]  ;;  %v375_v44 = vld [vmem:[#allocation5 + $0x1] ss:$2 sm:$0x3f] }
  0x48   : > { %927 = vmatpush.bf16.msra.mxu2 %v1368_v23  ;;  %v356_v46 = vperm.slane %v349_v39, 0  ;;  %v357_v47 = vperm.slane %v349_v39, 1  ;;  %v358_v48 = vperm.slane %v349_v39, 2  ;;  %v359_v49 = vperm.slane %v349_v39, 3  ;;  %v405_v50 = vld [vmem:[#allocation7] sm:$0x3f] }
  0x49   : > { %940 = vmatpush.bf16.msra.mxu3 %v1376_v24  ;;  %v360_v52 = vperm.slane %v349_v39, 4  ;;  %v361_v53 = vperm.slane %v349_v39, 5  ;;  %v381_v54 = vperm.slane %v375_v44, 0  ;;  %v382_v56 = vperm.slane %v375_v44, 1  ;;  %v1382_v11 = vld [vmem:[#allocation10 + $0x110] sm:$0xff] }
  0x4a   : > { %902 = vmatpush.bf16.msra.mxu0 %v1351_v13  ;;  %v383_v57 = vperm.slane %v375_v44, 2  ;;  %v384_v58 = vperm.slane %v375_v44, 3  ;;  %v385_v59 = vperm.slane %v375_v44, 4  ;;  %v386_v62 = vperm.slane %v375_v44, 5  ;;  %v1380_v44 = vld [vmem:[#allocation10 + $0x100] sm:$0xff] }
  0x4b   : > { %915 = vmatpush.bf16.msra.mxu1 %v1359_v14  ;;  %v407_v63 = vperm.slane %v405_v50, 0  ;;  %v408_v0 = vperm.slane %v405_v50, 1  ;;  %v409_v1 = vperm.slane %v405_v50, 2  ;;  %v410_v2 = vperm.slane %v405_v50, 3 }
  0x4c   : > { %928 = vmatpush.bf16.msra.mxu2 %v1367_v27  ;;  %v411_v3 = vperm.slane %v405_v50, 4  ;;  %v412_v4 = vperm.slane %v405_v50, 5 }
  0x4d   : > { %941 = vmatpush.bf16.msra.mxu3 %v1375_v28  ;;  %v1381_v28 = vld [vmem:[#allocation10 + $0x108] sm:$0xff] }
  0x4e   : > { %903 = vmatpush.bf16.msra.mxu0 %v1350_v17 }
  0x4f   : > { %916 = vmatpush.bf16.msra.mxu1 %v1358_v18 }
  0x50   : > { %929 = vmatpush.bf16.msra.mxu2 %v1366_v31 }
  0x51   : > { %942 = vmatpush.bf16.msra.mxu3 %v1374_v32 }
  0x52   : > { %904 = vmatpush.bf16.msra.mxu0 %v1349_v21 }
  0x53   : > { %917 = vmatpush.bf16.msra.mxu1 %v1357_v22 }
  0x54   : > { %930 = vmatpush.bf16.msra.mxu2 %v1365_v35 }
  0x55   : > { %943 = vmatpush.bf16.msra.mxu3 %v1373_v36 }
  0x56   : > { %905 = vmatpush.bf16.msra.mxu0 %v1348_v25 }
  0x57   : > { %918 = vmatpush.bf16.msra.mxu1 %v1356_v26 }
  0x58   : > { %931 = vmatpush.bf16.msra.mxu2 %v1364_v41 }
  0x59   : > { %944 = vmatpush.bf16.msra.mxu3 %v1372_v42 }
  0x5a   : > { %950 = vmatpush.bf16.msrb.mxu0 %v1387_v29 }
  0x5b   : > { %963 = vmatpush.bf16.msrb.mxu1 %v1395_v30 }
  0x5e   : > { %951 = vmatpush.bf16.msrb.mxu0 %v1386_v33  ;;  %v1389_v33 = vld [vmem:[#allocation10 + $0x148] sm:$0xff] }
  0x5f   : > { %964 = vmatpush.bf16.msrb.mxu1 %v1394_v34 }
  0x62   : > { %952 = vmatpush.bf16.msrb.mxu0 %v1385_v37 }
  0x63   : > { %965 = vmatpush.bf16.msrb.mxu1 %v1393_v38 }
  0x66   : > { %953 = vmatpush.bf16.msrb.mxu0 %v1384_v43 }
  0x67   : > { %966 = vmatpush.bf16.msrb.mxu1 %v1392_v45 }
  0x6a   : > { %954 = vmatpush.bf16.msrb.mxu0 %v1383_v60 }
  0x6b   : > { %967 = vmatpush.bf16.msrb.mxu1 %v1391_v61 }
  0x6e   : > { %955 = vmatpush.bf16.msrb.mxu0 %v1382_v11 }
  0x6f   : > { %968 = vmatpush.bf16.msrb.mxu1 %v1390_v16 }
  0x72   : > { %956 = vmatpush.bf16.msrb.mxu0 %v1381_v28 }
  0x73   : > { %969 = vmatpush.bf16.msrb.mxu1 %v1389_v33 }
  0x76   : > { %957 = vmatpush.bf16.msrb.mxu0 %v1380_v44 }
  0xac   : > { %v353_v40 = vpop.permute.xlu0 %352 }
  0xad   : > { %v368_v6 = vmul.f32 %v356_v46, %v353_v40  ;;  %v369_v7 = vmul.f32 %v357_v47, %v353_v40  ;;  %v370_v8 = vmul.f32 %v358_v48, %v353_v40  ;;  %v371_v9 = vmul.f32 %v359_v49, %v353_v40  ;;  %v1388_v49 = vld [vmem:[#allocation10 + $0x140] sm:$0xff] }
  0xae   : > { %v372_v17 = vmul.f32 %v360_v52, %v353_v40  ;;  %v373_v18 = vmul.f32 %v361_v53, %v353_v40  ;;  %970 = vmatpush.bf16.msrb.mxu1 %v1388_v49 }
  0xb5   : > { %v378_v10 = vpop.permute.xlu0 %377 }
  0xb6   : > { %v393_v12 = vmul.f32 %v381_v54, %v378_v10  ;;  %v394_v13 = vmul.f32 %v382_v56, %v378_v10  ;;  %v395_v14 = vmul.f32 %v383_v57, %v378_v10  ;;  %v396_v15 = vmul.f32 %v384_v58, %v378_v10 }
  0xb7   : > { %v397_v19 = vmul.f32 %v385_v59, %v378_v10  ;;  %v398_v20 = vmul.f32 %v386_v62, %v378_v10  ;;  %v480_v10 = vld [vmem:[%s1927_s28] sm:$0xff] }
  0xb8   : > { %v399_v21 = vadd.f32 %v393_v12, %v368_v6  ;;  %v400_v22 = vadd.f32 %v394_v13, %v369_v7  ;;  %v401_v23 = vadd.f32 %v395_v14, %v370_v8  ;;  %v402_v24 = vadd.f32 %v396_v15, %v371_v9  ;;  %v481_v15 = vld [vmem:[%s1927_s28 + $0x8] sm:$0xff] }
  0xb9   : > { %v403_v26 = vadd.f32 %v397_v19, %v372_v17  ;;  %v404_v27 = vadd.f32 %v398_v20, %v373_v18  ;;  %v489_v25 = vunpack.c.h.bf16 %v481_v15 }
  0xba   : > { %v419_v29 = vadd.f32 %v407_v63, %v399_v21  ;;  %v420_v30 = vadd.f32 %v408_v0, %v400_v22  ;;  %v421_v31 = vadd.f32 %v409_v1, %v401_v23  ;;  %v422_v32 = vadd.f32 %v410_v2, %v402_v24 }
  0xbb   : > { %v423_v34 = vadd.f32 %v411_v3, %v403_v26  ;;  %v424_v35 = vadd.f32 %v412_v4, %v404_v27  ;;  %v486_v21 = vunpack.c.l.bf16 %v480_v10  ;;  %v487_v22 = vunpack.c.h.bf16 %v480_v10 }
  0xbc   : > { %v431_v36 = vsel %vm1938_vm0, %v419_v29, 0.0  ;;  %v432_v37 = vsel %vm1938_vm0, %v420_v30, 0.0  ;;  %v433_v38 = vsel %vm1938_vm0, %v421_v31, 0.0  ;;  %v434_v39 = vsel %vm1938_vm0, %v422_v32, 0.0 }
  0xbd   : > { %v435_v40 = vsel %vm1938_vm0, %v423_v34, 0.0  ;;  %v436_v41 = vsel %vm1938_vm0, %v424_v35, 0.0  ;;  %v438_v42 = vsel %vm437_vm1, %v431_v36, 0.0  ;;  %v445_v43 = vsel %vm437_vm1, %v432_v37, 0.0 }
  0xbe   : > { %v439_v45 = vrot.slane %v438_v42, 4  ;;  %v446_v46 = vrot.slane %v445_v43, 4  ;;  %v452_v47 = vsel %vm437_vm1, %v433_v38, 0.0  ;;  %v459_v48 = vsel %vm437_vm1, %v434_v39, 0.0 }
  0xbf   : > { %v453_v50 = vrot.slane %v452_v47, 4  ;;  %v460_v51 = vrot.slane %v459_v48, 4  ;;  %v466_v52 = vsel %vm437_vm1, %v435_v40, 0.0  ;;  %v473_v53 = vsel %vm437_vm1, %v436_v41, 0.0 }
  0xc0   : > { %v440_v54 = vadd.f32 %v439_v45, %v438_v42  ;;  %v447_v55 = vadd.f32 %v446_v46, %v445_v43  ;;  %v467_v56 = vrot.slane %v466_v52, 4  ;;  %v474_v57 = vrot.slane %v473_v53, 4  ;;  %v482_v43 = vld [vmem:[%s1927_s28 + $0x10] sm:$0xff]  ;;  %s1683_s28 = scalar_lea.hbm %s2011_s6, 8 }
  0xc1   : > { %v454_v58 = vadd.f32 %v453_v50, %v452_v47  ;;  %v461_v59 = vadd.f32 %v460_v51, %v459_v48  ;;  %v488_v24 = vunpack.c.l.bf16 %v481_v15  ;;  %v490_v44 = vunpack.c.l.bf16 %v482_v43  ;;  %p1685_p12 = scmp.lt.s32.totalorder %s1683_s28, %s1679_s19 }
  0xc2   : > { %v441_v60 = vrot.slane %v440_v54, 2  ;;  %v448_v61 = vrot.slane %v447_v55, 2  ;;  %v468_v62 = vadd.f32 %v467_v56, %v466_v52  ;;  %v475_v63 = vadd.f32 %v474_v57, %v473_v53 }
  0xc3   : > { %v455_v0 = vrot.slane %v454_v58, 2  ;;  %v462_v1 = vrot.slane %v461_v59, 2  ;;  %v491_v46 = vunpack.c.h.bf16 %v482_v43  ;;  %p1686_p13 = por %p1685_p12, %p1684_p8 }
  0xc4   : > { %v442_v2 = vadd.f32 %v441_v60, %v440_v54  ;;  %v449_v3 = vadd.f32 %v448_v61, %v447_v55  ;;  %v469_v4 = vrot.slane %v468_v62, 2  ;;  %v476_v5 = vrot.slane %v475_v63, 2  ;;  %v1508_v54 = vld [vmem:[%s2010_s5] ss:$0 sm:$0xff] }
  0xc5   : > { %v456_v6 = vadd.f32 %v455_v0, %v454_v58  ;;  %v463_v7 = vadd.f32 %v462_v1, %v461_v59  ;;  %p1687_p0 = pnand %p1686_p13, %p1682_p4 }
  0xc6   : > { %v443_v8 = vrot.slane %v442_v2, 1  ;;  %v450_v9 = vrot.slane %v449_v3, 1  ;;  %v470_v16 = vadd.f32 %v469_v4, %v468_v62  ;;  %v477_v17 = vadd.f32 %v476_v5, %v475_v63 }
  0xc7   : > { %v457_v11 = vrot.slane %v456_v6, 1  ;;  %v464_v12 = vrot.slane %v463_v7, 1 }
  0xc8   : > { %v444_v13 = vadd.f32 %v443_v8, %v442_v2  ;;  %v451_v14 = vadd.f32 %v450_v9, %v449_v3  ;;  %v471_v28 = vrot.slane %v470_v16, 1  ;;  %v478_v29 = vrot.slane %v477_v17, 1 }
  0xc9   : > { %v458_v18 = vadd.f32 %v457_v11, %v456_v6  ;;  %v465_v19 = vadd.f32 %v464_v12, %v463_v7 }
  0xca   : > { %v483_v20 = vpack.c.bf16 %v451_v14, %v444_v13  ;;  %v472_v38 = vadd.f32 %v471_v28, %v470_v16  ;;  %v479_v39 = vadd.f32 %v478_v29, %v477_v17 }
  0xcb   : > { %v484_v23 = vpack.c.bf16 %v465_v19, %v458_v18 }
  0xcc   : > { %v492_v26 = vunpack.c.l.bf16 %v483_v20  ;;  %v493_v27 = vunpack.c.h.bf16 %v483_v20  ;;  %v485_v42 = vpack.c.bf16 %v479_v39, %v472_v38 }
  0xcd   : > { %v494_v30 = vunpack.c.l.bf16 %v484_v23  ;;  %v495_v31 = vunpack.c.h.bf16 %v484_v23 }
  0xce   : > { %v498_v32 = vadd.f32 %v492_v26, %v486_v21  ;;  %v499_v33 = vadd.f32 %v493_v27, %v487_v22  ;;  %v496_v45 = vunpack.c.l.bf16 %v485_v42  ;;  %v497_v47 = vunpack.c.h.bf16 %v485_v42 }
  0xcf   : > { %v500_v34 = vadd.f32 %v494_v30, %v488_v24  ;;  %v501_v35 = vadd.f32 %v495_v31, %v489_v25 }
  0xd0   : > { %v504_v36 = vpack.c.bf16 %v498_v32, %v498_v32  ;;  %v505_v37 = vpack.c.bf16 %v499_v33, %v499_v33  ;;  %v502_v48 = vadd.f32 %v496_v45, %v490_v44  ;;  %v503_v49 = vadd.f32 %v497_v47, %v491_v46 }
  0xd1   : > { %v506_v40 = vpack.c.bf16 %v500_v34, %v500_v34  ;;  %v507_v41 = vpack.c.bf16 %v501_v35, %v501_v35 }
  0xd2   : > { %906 = vmatmul.bf16.vlgmr.msra.gmra.mxu0 %v504_v36  ;;  %919 = vmatmul.bf16.vlgmr.msra.gmra.mxu1 %v505_v37  ;;  %v508_v50 = vpack.c.bf16 %v502_v48, %v502_v48  ;;  %v509_v51 = vpack.c.bf16 %v503_v49, %v503_v49 }
  0xd3   : > { %932 = vmatmul.bf16.vlgmr.msra.gmra.mxu2 %v506_v40  ;;  %945 = vmatmul.bf16.vlgmr.msra.gmra.mxu3 %v507_v41 }
  0xe2   : > { %958 = vmatmul.bf16.vlgmr.msrb.gmra.mxu0 %v508_v50  ;;  %971 = vmatmul.bf16.vlgmr.msrb.gmra.mxu1 %v509_v51 }
 0x14f   : > { %v907_v52 = vpop.f32.mrf.mxu0  ;;  %v920_v53 = vpop.f32.mrf.mxu1 }
 0x150   : > { %v908_v55 = vadd.f32 %v1508_v54, %v907_v52 }
 0x152   : > { %v921_v60 = vadd.f32 %v920_v53, %v908_v55 }
 0x156   : > { %v933_v56 = vpop.f32.mrf.mxu2  ;;  %v946_v57 = vpop.f32.mrf.mxu3 }
 0x157   : > { %v909_v58 = vpop.f32.mrf.mxu0  ;;  %v922_v59 = vpop.f32.mrf.mxu1  ;;  %v934_v61 = vadd.f32 %v933_v56, %v921_v60 }
 0x159   : > { %v947_v62 = vadd.f32 %v946_v57, %v934_v61 }
 0x15e   : > { %v935_v63 = vpop.f32.mrf.mxu2  ;;  %v948_v0 = vpop.f32.mrf.mxu3 }
 0x15f   : > { %v959_v1 = vpop.f32.mrf.mxu0  ;;  %v972_v2 = vpop.f32.mrf.mxu1 }
 0x160   : > { %v960_v3 = vadd.f32 %v959_v1, %v947_v62 }
 0x162   : > { %v973_v4 = vadd.f32 %v972_v2, %v960_v3 }
 0x164   : > { %v976_v5 = vsub.f32 0.0, %v973_v4 }
 0x166   : > { %v977_v6 = vmul.f32 1.442695, %v976_v5 }
 0x167   : > { %v961_v7 = vpop.f32.mrf.mxu0  ;;  %v974_v8 = vpop.f32.mrf.mxu1 }
 0x168   : > { %1509 = vpow2.f32 %v977_v6 }
 0x16e   : > { %v1510_v9 = vpop.eup %1509 }
 0x16f   : > { %v979_v10 = vadd.f32 1.0, %v1510_v9 }
 0x171   : > { %1511 = vrcp.f32 %v979_v10  ;;  %v991_v14 = vand.u32 2147483648, %v979_v10  ;;  %v989_v16 = vand.u32 2147483647, %v979_v10  ;;  %vm985_vm3 = vweird.f32 %v979_v10 }
 0x173   : > { %v992_v18 = vor.u32 1.1754944e-38, %v991_v14  ;;  %vm990_vm5 = vcmp.eq.f32.partialorder %v989_v16, 8.507059e+37 }
 0x177   : > { %v1512_v11 = vpop.eup %1511 }
 0x178   : > { %v981_v12 = vmul.f32 %v1512_v11, %v979_v10  ;;  %vm986_vm2 = vweird.f32 %v1512_v11 }
 0x179   : > { %vm987_vm4 = vmor %vm985_vm3, %vm986_vm2 }
 0x17a   : > { %v982_v13 = vsub.f32 1.0, %v981_v12 }
 0x17c   : > { %v983_v15 = vmul.f32 %v1512_v11, %v982_v13 }
 0x17e   : > { %v984_v17 = vadd.f32 %v1512_v11, %v983_v15 }
 0x180   : > { %v988_v19 = vsel %vm987_vm4, %v1512_v11, %v984_v17 }
 0x181   : > { %v993_v20 = vsel %vm990_vm5, %v992_v18, %v988_v19 }
 0x182   : > { %v994_v21 = vmul.f32 %v993_v20, %v993_v20 }
 0x184   : > { %v995_v22 = vmul.f32 %v994_v21, %v994_v21 }
 0x186   : > { %v996_v23 = vpack.c.bf16 %v995_v22, %v995_v22 }
 0x188   : > { %997 = vst [vmem:[%s347_s12] sm:$0xf] %v996_v23 }
 0x189   : > { %1690 = shalt.err (!%p1687_p0)
}
 0x18a   : > { %1417 = dma.vmem_to_hbm [thread:$0]  (%p1895_p7), %s1013_s14, 64, %s1015_s15, %s999_s24  }
 0x18b PF: > { %s1026_s0 = sand.u32 1, %s1737_s21   ;;  %p1437_p3 = pnand %p1144_p9, %p1847_p6 }
 0x18c   : > { %s1027_s16 = scalar_lea.sflag [#allocation4], %s1026_s0 }
 0x18d   : > { %p1438_p5 = pneg %p1437_p3 }
 0x18f   : > { %1732 = dma.done.wait (%p1438_p5), %s1027_s16, 64  }
 0x190   : > { %1734 = vsyncadd (%p1438_p5), %s1027_s16, 4294967232  ;;  %s24_s26 = sadd.s32 1, %s1757_s26   ;;  %s2023_s21 = smov %s1741_s22 }
 0x191   : > { %p21_p10 = scmp.ge.s32.totalorder %s24_s26, 4   ;;  %s2024_s22 = smov %s1745_s23 }
 0x192   : > { %s2025_s23 = smov %s1905_s11  ;;  %s2026_s24 = smov %s1753_s25 }
 0x193   : > { %s2027_s25 = smov %s2029_s18  ;;  %23 = sbr.rel (!%p21_p10) target bundleno = 11 (0xb), region = 107 }
 0x198   :  { %1033 = vsyncpa [#allocation3], 1 }
 0x199   :  { %1035 = vsyncpa [#allocation3 + $0x1], 1 }
 0x19a   :  { %1036 = vsyncpa [#allocation6], 1 }
 0x19b   :  { %1037 = vsyncpa [#allocation9], 1 }
 0x19c   :  { %1039 = vsyncpa [#allocation9 + $0x1], 1 }
 0x19d   :  { %1040 = vsyncpa [#allocation4], 1 }
 0x19e   :  { %1042 = vsyncpa [#allocation4 + $0x1], 1 }

</bundles_post_ra>
